<compile_context>
chip_gen: v7x
topology: tpu7x:2x2x1
jax: 0.10.0
libtpu: 0.0.40
codegen_flags: <defaults>
</compile_context>

<pallas_src>
import functools

import jax
import jax.numpy as jnp
from jax.experimental import pallas as pl
from jax.experimental.pallas import tpu as pltpu


def _round_up(n, m):
    return ((n + m - 1) // m) * m


def _pick_o_tile(o_pad, max_tile):
    """Largest multiple of 128 that divides o_pad and is <= max_tile."""
    if o_pad <= max_tile:
        return o_pad
    t = (max_tile // 128) * 128
    while t > 128 and o_pad % t:
        t -= 128
    return t


def _bernstein_kernel(x_ref, coef_ref, o_ref, *, order, zoom, pan, r0, r1,
                      mxu_dtype):
    K = order + 1

    # Elementwise path in f32 (upcast happens after the DMA; tanh uses the EUP).
    x = x_ref[...].astype(jnp.float32)                       # (TB, I_pad)
    t = jnp.tanh(x) * zoom + pan
    xa = t - r0
    xb = r1 - t

    # Stream chunks[k] = xa^k * xb^(order-k) into the slab slots with only one
    # running power live at a time (low vreg pressure).
    chunks = [None] * K
    cur = jnp.ones_like(xa)
    chunks[order] = cur                                       # xb^0
    for k in range(order - 1, -1, -1):                        # xb^(order-k)
        cur = cur * xb
        chunks[k] = cur
    if order >= 1:
        cur = xa                                              # xa^1
        for k in range(1, K):
            chunks[k] = chunks[k] * cur
            if k + 1 < K:
                cur = cur * xa

    # Lane-dense (TB, K*I_pad) slab -> ONE MXU matmul, f32 accumulation.
    slab = jnp.concatenate(chunks, axis=-1).astype(mxu_dtype)
    o_ref[...] = jnp.dot(
        slab, coef_ref[...], preferred_element_type=jnp.float32
    ).astype(o_ref.dtype)


def prepare_bernstein_coef(coef, order, *, mxu_dtype=jnp.bfloat16):
    """(O, I, K) -> zero-padded (K*I_pad, O_pad) matmul RHS.

    Hoist this out of the per-call path (precompute once at parameter-prep
    time) when the layer is applied repeatedly, e.g. inside a training step.
    """
    O, I, K = coef.shape
    assert K == order + 1
    I_pad = _round_up(I, 128)
    O_pad = _round_up(O, 128)
    coef_t = jnp.transpose(coef, (2, 1, 0))                   # (K, I, O)
    coef_t = jnp.pad(coef_t, ((0, 0), (0, I_pad - I), (0, O_pad - O)))
    return coef_t.reshape(K * I_pad, O_pad).astype(mxu_dtype)


def custom_bernstein_layer(x, coef, order, inter_range, *,
                           mxu_dtype=jnp.bfloat16, block_b=256, block_o=512):
    """x: (B, I) float; coef: (O, I, order+1) float. Returns (B, O) float32."""
    r0, r1 = float(inter_range[0]), float(inter_range[-1])
    zoom = (r1 - r0) / 2.0
    pan = (r1 + r0) / 2.0

    B, I = x.shape
    O, I2, K = coef.shape
    assert I2 == I and K == order + 1

    I_pad = _round_up(I, 128)
    O_pad = _round_up(O, 128)
    TB = min(_round_up(B, 8), block_b)                        # batch tile (sublane-aligned)
    B_pad = _round_up(B, TB)
    TO = _pick_o_tile(O_pad, block_o)                         # output tile (lane-aligned)

    # TODO(synk): for repeated calls, call prepare_bernstein_coef once at
    # parameter-prep time instead of per forward.
    coef_mat = prepare_bernstein_coef(coef, order, mxu_dtype=mxu_dtype)

    # Zero-pad x: padded feature lanes hit zero coef rows (no effect); padded
    # batch rows are sliced off. Keep the caller dtype; f32 upcast is in-kernel.
    if (B_pad, I_pad) != (B, I):
        x_p = jnp.pad(x, ((0, B_pad - B), (0, I_pad - I)))
    else:
        x_p = x

    kernel = functools.partial(
        _bernstein_kernel, order=order, zoom=zoom, pan=pan, r0=r0, r1=r1,
        mxu_dtype=mxu_dtype,
    )

    out = pl.pallas_call(
        kernel,
        out_shape=jax.ShapeDtypeStruct((B_pad, O_pad), jnp.float32),
        grid=(B_pad // TB, O_pad // TO),
        in_specs=[
            pl.BlockSpec((TB, I_pad), lambda i, j: (i, 0)),        # x: batch-tiled
            pl.BlockSpec((K * I_pad, TO), lambda i, j: (0, j)),    # coef: O-tiled, batch-resident
        ],
        out_specs=pl.BlockSpec((TB, TO), lambda i, j: (i, j)),     # lane-dense output
        compiler_params=pltpu.CompilerParams(
            dimension_semantics=("parallel", "parallel"),
        ),
    )(x_p, coef_mat)

    if (B_pad, O_pad) != (B, O):
        out = out[:B, :O]
    return out


def _reference(x, coef, order, inter_range, mxu_dtype=jnp.float32):
    """Pure-JAX reference; optionally quantizes MXU operands like the kernel."""
    r0, r1 = float(inter_range[0]), float(inter_range[-1])
    zoom = (r1 - r0) / 2.0
    pan = (r1 + r0) / 2.0
    K = order + 1
    xf = x.astype(jnp.float32)
    t = jnp.tanh(xf) * zoom + pan
    xa = t - r0
    xb = r1 - t
    xa_n = [jnp.ones_like(xa)]
    xb_n = [jnp.ones_like(xb)]
    for _ in range(1, K):
        xa_n.append(xa_n[-1] * xa)
        xb_n.append(xb_n[-1] * xb)
    ber = jnp.stack([xa_n[k] * xb_n[order - k] for k in range(K)], axis=2)  # (B,I,K)
    ber_q = ber.astype(mxu_dtype).astype(jnp.float32)
    coef_q = coef.astype(jnp.float32).astype(mxu_dtype).astype(jnp.float32)
    return jnp.einsum("oik,bik->bo", coef_q, ber_q, precision="highest")


if __name__ == "__main__":
    batch = 8
    input_size = 16
    output_size = 8
    order = 5
    inter_range = [-1.0, 1.0]

    key = jax.random.PRNGKey(0)
    kx, kc = jax.random.split(key)
    x = jax.random.normal(kx, (batch, input_size), dtype=jnp.float32)
    coef = jax.random.normal(
        kc, (output_size, input_size, order + 1), dtype=jnp.float32
    ) * 0.1

    out = custom_bernstein_layer(x, coef, order, inter_range)
    out = jax.block_until_ready(out)
    assert out.shape == (batch, output_size)

    # Tight check against a reference with the same bf16 MXU-operand quantization,
    # plus a sanity check against the pure-f32 math at bf16-appropriate tolerance.
    ref_q = _reference(x, coef, order, inter_range, mxu_dtype=jnp.bfloat16)
    ref_f = _reference(x, coef, order, inter_range, mxu_dtype=jnp.float32)
    assert jnp.allclose(out, ref_q, atol=1e-2, rtol=1e-2), "mismatch vs quantized reference"
    assert jnp.allclose(out, ref_f, atol=1e-1, rtol=1e-1), "mismatch vs f32 reference"

    print("KERNEL_OK")
</pallas_src>

<mosaic_0001>
module attributes {stable_mosaic.version = 11 : i64} {
  func.func @_bernstein_kernel(%arg0: i32, %arg1: i32, %arg2: memref<8x128xf32, #tpu.memory_space<vmem>>, %arg3: memref<768x128xbf16, #tpu.memory_space<vmem>>, %arg4: memref<8x128xf32, #tpu.memory_space<vmem>>) attributes {dimension_semantics = [#tpu.dimension_semantics<parallel>, #tpu.dimension_semantics<parallel>], iteration_bounds = array<i64: 1, 1>, scalar_prefetch = 0 : i64, scratch_operands = 0 : i64, tpu.core_type = #tpu.core_type<tc>, window_params = [{transform_indices = @transform_0, window_bounds = array<i64: 8, 128>}, {transform_indices = @transform_1, window_bounds = array<i64: 768, 128>}, {transform_indices = @transform_2, window_bounds = array<i64: 8, 128>}]} {
    %c0 = arith.constant 0 : index
    %c0_0 = arith.constant 0 : index
    %0 = vector.load %arg2[%c0, %c0_0] : memref<8x128xf32, #tpu.memory_space<vmem>>, vector<8x128xf32>
    %1 = math.tanh %0 : vector<8x128xf32>
    %cst = arith.constant 1.000000e+00 : f32
    %2 = vector.broadcast %cst : f32 to vector<8x128xf32>
    %3 = arith.mulf %1, %2 : vector<8x128xf32>
    %cst_1 = arith.constant 0.000000e+00 : f32
    %4 = vector.broadcast %cst_1 : f32 to vector<8x128xf32>
    %5 = arith.addf %3, %4 : vector<8x128xf32>
    %cst_2 = arith.constant -1.000000e+00 : f32
    %6 = vector.broadcast %cst_2 : f32 to vector<8x128xf32>
    %7 = arith.subf %5, %6 : vector<8x128xf32>
    %cst_3 = arith.constant 1.000000e+00 : f32
    %8 = vector.broadcast %cst_3 : f32 to vector<8x128xf32>
    %9 = arith.subf %8, %5 : vector<8x128xf32>
    %cst_4 = arith.constant 1.000000e+00 : f32
    %10 = vector.broadcast %cst_4 : f32 to vector<8x128xf32>
    %11 = arith.mulf %10, %9 : vector<8x128xf32>
    %12 = arith.mulf %11, %9 : vector<8x128xf32>
    %13 = arith.mulf %12, %9 : vector<8x128xf32>
    %14 = arith.mulf %13, %9 : vector<8x128xf32>
    %15 = arith.mulf %14, %9 : vector<8x128xf32>
    %16 = arith.mulf %14, %7 : vector<8x128xf32>
    %17 = arith.mulf %7, %7 : vector<8x128xf32>
    %18 = arith.mulf %13, %17 : vector<8x128xf32>
    %19 = arith.mulf %17, %7 : vector<8x128xf32>
    %20 = arith.mulf %12, %19 : vector<8x128xf32>
    %21 = arith.mulf %19, %7 : vector<8x128xf32>
    %22 = arith.mulf %11, %21 : vector<8x128xf32>
    %23 = arith.mulf %21, %7 : vector<8x128xf32>
    %24 = arith.mulf %10, %23 : vector<8x128xf32>
    %25 = tpu.concatenate %15, %16, %18, %20, %22, %24 in 1 : vector<8x128xf32>, vector<8x128xf32>, vector<8x128xf32>, vector<8x128xf32>, vector<8x128xf32>, vector<8x128xf32> -> vector<8x768xf32>
    %26 = arith.truncf %25 : vector<8x768xf32> to vector<8x768xbf16>
    %c0_5 = arith.constant 0 : index
    %c0_6 = arith.constant 0 : index
    %27 = vector.load %arg3[%c0_5, %c0_6] : memref<768x128xbf16, #tpu.memory_space<vmem>>, vector<768x128xbf16>
    %cst_7 = arith.constant dense<0.000000e+00> : vector<8x128xf32>
    %28 = tpu.matmul %26, %27, %cst_7 {dimension_numbers = #tpu.dot_dimension_numbers<[1], [0], [0], [1], [0, 0, 1, 1], [], []>} : vector<8x768xbf16>, vector<768x128xbf16>, vector<8x128xf32> -> vector<8x128xf32>
    %c0_8 = arith.constant 0 : index
    %c0_9 = arith.constant 0 : index
    %29 = vector.load %arg4[%c0_8, %c0_9] : memref<8x128xf32, #tpu.memory_space<vmem>>, vector<8x128xf32>
    tpu.vector_store %arg4[%c0_8, %c0_9], %28 {strides = array<i32>} : memref<8x128xf32, #tpu.memory_space<vmem>>, vector<8x128xf32>,
    return
  }
  func.func @transform_0(%arg0: i32, %arg1: i32) -> (i32, i32) {
    %c0_i32 = arith.constant 0 : i32
    %c0_i32_0 = arith.constant 0 : i32
    return %arg0, %c0_i32 : i32, i32
  }
  func.func @transform_1(%arg0: i32, %arg1: i32) -> (i32, i32) {
    %c0_i32 = arith.constant 0 : i32
    %c0_i32_0 = arith.constant 0 : i32
    return %c0_i32, %arg1 : i32, i32
  }
  func.func @transform_2(%arg0: i32, %arg1: i32) -> (i32, i32) {
    %c0_i32 = arith.constant 0 : i32
    return %arg0, %arg1 : i32, i32
  }
}

</mosaic_0001>

<bundles_post_ra>
// kernel: tpu_custom_call.1
= control target key start
LH: loop header
LB: loop body
LE: loop exit
PB: predicated region body
PF: predicated region fallthrough
CT: control target
= control target key end

     0   :  { %7 = vsyncpa [#allocation3], 0  ;;  %s888_s0 = inlined_call_operand.hbm [shape: f32[8,128], index: 0, kind: input, shape index: {}]   ;;  %s889_s1 = inlined_call_operand.hbm [shape: bf16[768,128], index: 1, kind: input, shape index: {}]   ;;  %s890_s2 = inlined_call_operand.hbm [shape: f32[8,128], index: 2, kind: output, shape index: {}]  }
   0x1   :  { %8 = vsyncpa [#allocation6], 0 }
   0x2   :  { %9 = vsyncpa [#allocation4], 0  ;;  %s825_s9 = smov [#allocation2]   ;;  %s826_s11 = smov [#allocation5]  }
   0x3   :  { %s16_s10 = sshll.u32 %s825_s9, 4  ;;  %s25_s12 = sshll.u32 %s826_s11, 4  ;;  %s17_s10 = int_to_ptr.vmem [resolvable:$true] %s16_s10  ;;  %s845_s12 = int_to_ptr.vmem [resolvable:$true] %s25_s12 }
   0x4   :  { %s753_s15 = scalar_lea.hbm %s888_s0, 128 }
   0x5   :  { %p754_p0 = scmp.ne.s32.totalorder %s888_s0, %s753_s15  ;;  %p757_p1 = scmp.lt.u32.totalorder %s753_s15, %s888_s0 }
   0x7   :  { %p759_p2 = pnand %p757_p1, %p754_p0 }
   0x9   :  { %762 = shalt.err (!%p759_p2)
}
   0xa   :  { %s763_s20 = scalar_lea.vmem %s17_s10, 128  ;;  %p768_p4 = scmp.lt.s32.totalorder %s17_s10, %s17_s10 }
   0xb   :  { %p764_p3 = scmp.ne.s32.totalorder %s17_s10, %s763_s20  ;;  %p769_p5 = scmp.lt.s32.totalorder %s763_s20, %s763_s20 }
   0xd   :  { %p770_p6 = por %p769_p5, %p768_p4 }
   0xf   :  { %p771_p7 = pnand %p770_p6, %p764_p3 }
  0x11   :  { %774 = shalt.err (!%p771_p7)
}
  0x12   :  { %19 = dma.hbm_to_vmem [thread:$0]  %s888_s0, 128, %s17_s10, [#allocation3]  }
  0x13   :  { %s775_s25 = scalar_lea.hbm %s889_s1, 6144 }
  0x14   :  { %p776_p8 = scmp.ne.s32.totalorder %s889_s1, %s775_s25  ;;  %p779_p9 = scmp.lt.u32.totalorder %s775_s25, %s889_s1 }
  0x16   :  { %p781_p10 = pnand %p779_p9, %p776_p8 }
  0x18   :  { %784 = shalt.err (!%p781_p10)
}
  0x19   :  { %s785_s30 = scalar_lea.vmem %s845_s12, 6144  ;;  %p790_p12 = scmp.lt.s32.totalorder %s845_s12, %s845_s12 }
  0x1a   :  { %p786_p11 = scmp.ne.s32.totalorder %s845_s12, %s785_s30  ;;  %p791_p13 = scmp.lt.s32.totalorder %s785_s30, %s785_s30 }
  0x1c   :  { %p792_p0 = por %p791_p13, %p790_p12 }
  0x1e   :  { %p793_p1 = pnand %p792_p0, %p786_p11 }
  0x20   :  { %796 = shalt.err (!%p793_p1)
}
  0x21   :  { %s827_s0 = smov 64   ;;  %s828_s3 = smov 4  }
  0x22   :  { %31 = dma.hbm_to_vmem [thread:$0]  %s889_s1, 6144, %s845_s12, [#allocation6], %s827_s0, %s827_s0, %s828_s3  }
  0x23   :  { %819 = dma.done.wait [#allocation3], 128  }
  0x24   :  { %820 = vsyncadd [#allocation3], 4294967168 }
  0x25   :  { %821 = dma.done.wait [#allocation6], 6144  }
  0x26   :  { %822 = vsyncadd [#allocation6], 4294961152  ;;  %v703_v0 = vld [vmem:[#allocation5 + $0x40] sm:$0xff]   ;;  %v707_v4 = vld [vmem:[#allocation5 + $0x48] sm:$0xff]   ;;  %s829_s1 = smov [#allocation7]  }
  0x27   :  { %v704_v1 = vld [vmem:[#allocation5 + $0xc0] sm:$0xff]   ;;  %632 = vmatprep.subr.bf16.mxu0 %v703_v0  ;;  %v708_v5 = vld [vmem:[#allocation5 + $0xc8] sm:$0xff]   ;;  %v711_v8 = vld [vmem:[#allocation5 + $0x50] sm:$0xff]   ;;  %s573_s6 = sshll.u32 %s829_s1, 4  ;;  %s574_s6 = int_to_ptr.vmem [resolvable:$true] %s573_s6 }
  0x28   :  { %v705_v2 = vld [vmem:[#allocation5] sm:$0xff]   ;;  %654 = vmatprep.subr.bf16.mxu1 %v704_v1  ;;  %v709_v6 = vld [vmem:[#allocation5 + $0x8] sm:$0xff]   ;;  %v712_v9 = vld [vmem:[#allocation5 + $0xd0] sm:$0xff]   ;;  %s797_s7 = scalar_lea.vmem %s574_s6, 128  ;;  %p802_p3 = scmp.lt.s32.totalorder %s574_s6, %s574_s6 }
  0x29   :  { %v706_v3 = vld [vmem:[#allocation5 + $0x80] sm:$0xff]   ;;  %633 = vmatpush3.bf16.msra.mxu0 %v705_v2  ;;  %v710_v7 = vld [vmem:[#allocation5 + $0x88] sm:$0xff]   ;;  %v713_v10 = vld [vmem:[#allocation5 + $0x10] sm:$0xff]   ;;  %p798_p2 = scmp.ne.s32.totalorder %s574_s6, %s797_s7  ;;  %p803_p4 = scmp.lt.s32.totalorder %s797_s7, %s797_s7 }
  0x2a   :  { %655 = vmatpush3.bf16.msra.mxu1 %v706_v3  ;;  %634 = vmatprep.subr.bf16.mxu0 %v707_v4  ;;  %v714_v11 = vld [vmem:[#allocation5 + $0x90] sm:$0xff]   ;;  %v715_v12 = vld [vmem:[#allocation5 + $0x58] sm:$0xff]   ;;  %v719_v16 = vld [vmem:[#allocation5 + $0x60] sm:$0xff]  }
  0x2b   :  { %656 = vmatprep.subr.bf16.mxu1 %v708_v5  ;;  %v716_v13 = vld [vmem:[#allocation5 + $0xd8] sm:$0xff]   ;;  %v720_v17 = vld [vmem:[#allocation5 + $0xe0] sm:$0xff]   ;;  %v723_v20 = vld [vmem:[#allocation5 + $0x68] sm:$0xff]   ;;  %p804_p5 = por %p803_p4, %p802_p3 }
  0x2c   :  { %v717_v14 = vld [vmem:[#allocation5 + $0x18] sm:$0xff]   ;;  %v721_v18 = vld [vmem:[#allocation5 + $0x20] sm:$0xff]   ;;  %v724_v21 = vld [vmem:[#allocation5 + $0xe8] sm:$0xff]  }
  0x2d   :  { %635 = vmatpush3.bf16.msra.mxu0 %v709_v6  ;;  %v718_v15 = vld [vmem:[#allocation5 + $0x98] sm:$0xff]   ;;  %v722_v19 = vld [vmem:[#allocation5 + $0xa0] sm:$0xff]   ;;  %v725_v22 = vld [vmem:[#allocation5 + $0x28] sm:$0xff]   ;;  %p805_p6 = pnand %p804_p5, %p798_p2 }
  0x2e   :  { %657 = vmatpush3.bf16.msra.mxu1 %v710_v7  ;;  %636 = vmatprep.subr.bf16.mxu0 %v711_v8  ;;  %v726_v23 = vld [vmem:[#allocation5 + $0xa8] sm:$0xff]   ;;  %v727_v24 = vld [vmem:[#allocation5 + $0x70] sm:$0xff]   ;;  %v731_v28 = vld [vmem:[#allocation5 + $0x78] sm:$0xff]  }
  0x2f   :  { %658 = vmatprep.subr.bf16.mxu1 %v712_v9  ;;  %v728_v25 = vld [vmem:[#allocation5 + $0xf0] sm:$0xff]   ;;  %v732_v29 = vld [vmem:[#allocation5 + $0xf8] sm:$0xff]   ;;  %v735_v33 = vld [vmem:[#allocation5 + $0x140] sm:$0xff]  }
  0x30   :  { %v729_v26 = vld [vmem:[#allocation5 + $0x30] sm:$0xff]   ;;  %v733_v30 = vld [vmem:[#allocation5 + $0x38] sm:$0xff]   ;;  %v736_v52 = vld [vmem:[#allocation5 + $0x100] sm:$0xff]  }
  0x31   :  { %637 = vmatpush3.bf16.msra.mxu0 %v713_v10  ;;  %v730_v27 = vld [vmem:[#allocation5 + $0xb0] sm:$0xff]   ;;  %v734_v31 = vld [vmem:[#allocation5 + $0xb8] sm:$0xff]   ;;  %v737_v53 = vld [vmem:[#allocation5 + $0x148] sm:$0xff]  }
  0x32   :  { %659 = vmatpush3.bf16.msra.mxu1 %v714_v11  ;;  %638 = vmatprep.subr.bf16.mxu0 %v715_v12  ;;  %v39_v32 = vld [vmem:[#allocation2] sm:$0xff]  ;;  %v738_v55 = vld [vmem:[#allocation5 + $0x108] sm:$0xff]   ;;  %v739_v56 = vld [vmem:[#allocation5 + $0x150] sm:$0xff]  }
  0x33   :  { %660 = vmatprep.subr.bf16.mxu1 %v716_v13  ;;  %751 = vtanh.f32 %v39_v32  ;;  %v740_v57 = vld [vmem:[#allocation5 + $0x110] sm:$0xff]   ;;  %v741_v58 = vld [vmem:[#allocation5 + $0x158] sm:$0xff]   ;;  %v743_v60 = vld [vmem:[#allocation5 + $0x160] sm:$0xff]  }
  0x34   :  { %v742_v59 = vld [vmem:[#allocation5 + $0x118] sm:$0xff]   ;;  %v744_v61 = vld [vmem:[#allocation5 + $0x120] sm:$0xff]   ;;  %v745_v62 = vld [vmem:[#allocation5 + $0x168] sm:$0xff]  }
  0x35   :  { %639 = vmatpush3.bf16.msra.mxu0 %v717_v14  ;;  %v746_v63 = vld [vmem:[#allocation5 + $0x128] sm:$0xff]   ;;  %v747_v0 = vld [vmem:[#allocation5 + $0x170] sm:$0xff]   ;;  %v749_v2 = vld [vmem:[#allocation5 + $0x178] sm:$0xff]  }
  0x36   :  { %661 = vmatpush3.bf16.msra.mxu1 %v718_v15  ;;  %640 = vmatprep.subr.bf16.mxu0 %v719_v16  ;;  %v748_v1 = vld [vmem:[#allocation5 + $0x130] sm:$0xff]   ;;  %v750_v4 = vld [vmem:[#allocation5 + $0x138] sm:$0xff]  }
  0x37   :  { %662 = vmatprep.subr.bf16.mxu1 %v720_v17 }
  0x39   :  { %641 = vmatpush3.bf16.msra.mxu0 %v721_v18 }
  0x3a   :  { %663 = vmatpush3.bf16.msra.mxu1 %v722_v19  ;;  %642 = vmatprep.subr.bf16.mxu0 %v723_v20 }
  0x3b   :  { %664 = vmatprep.subr.bf16.mxu1 %v724_v21 }
  0x3d   :  { %643 = vmatpush3.bf16.msra.mxu0 %v725_v22  ;;  %v752_v34 = vpop.eup %751 }
  0x3e   :  { %665 = vmatpush3.bf16.msra.mxu1 %v726_v23  ;;  %644 = vmatprep.subr.bf16.mxu0 %v727_v24  ;;  %v583_v35 = vadd.f32 1.0, %v752_v34  ;;  %v43_v36 = vsub.f32 1.0, %v752_v34 }
  0x3f   :  { %666 = vmatprep.subr.bf16.mxu1 %v728_v25 }
  0x40   :  { %v44_v37 = vmul.f32 %v43_v36, %v43_v36  ;;  %v49_v38 = vmul.f32 %v583_v35, %v583_v35 }
  0x41   :  { %645 = vmatpush3.bf16.msra.mxu0 %v729_v26 }
  0x42   :  { %667 = vmatpush3.bf16.msra.mxu1 %v730_v27  ;;  %646 = vmatprep.subr.bf16.mxu0 %v731_v28  ;;  %v45_v39 = vmul.f32 %v44_v37, %v43_v36  ;;  %v51_v40 = vmul.f32 %v583_v35, %v49_v38 }
  0x43   :  { %668 = vmatprep.subr.bf16.mxu1 %v732_v29 }
  0x44   :  { %v46_v41 = vmul.f32 %v45_v39, %v43_v36  ;;  %v52_v42 = vmul.f32 %v51_v40, %v44_v37  ;;  %v53_v43 = vmul.f32 %v583_v35, %v51_v40  ;;  %v50_v44 = vmul.f32 %v49_v38, %v45_v39 }
  0x45   :  { %647 = vmatpush3.bf16.msra.mxu0 %v733_v30 }
  0x46   :  { %669 = vmatpush3.bf16.msra.mxu1 %v734_v31  ;;  %676 = vmatprep.subr.bf16.mxu0 %v735_v33  ;;  %v48_v45 = vmul.f32 %v583_v35, %v46_v41  ;;  %v59_v46 = vpack.c.bf16 %v52_v42, %v52_v42  ;;  %v47_v47 = vmul.f32 %v46_v41, %v43_v36 }
  0x47   :  { %v58_v48 = vpack.c.bf16 %v50_v44, %v50_v44  ;;  %v55_v49 = vmul.f32 %v583_v35, %v53_v43  ;;  %v54_v3 = vmul.f32 %v53_v43, %v43_v36 }
  0x48   :  { %v57_v50 = vpack.c.bf16 %v48_v45, %v48_v45  ;;  %518 = vmatprep.mubr.bf16.mxu1 %v59_v46  ;;  %v56_v51 = vpack.c.bf16 %v47_v47, %v47_v47 }
  0x49   :  { %519 = vmatmul.mubr.bf16.vlgmr.msra.gmra.mrb[0].mxu1 %v58_v48  ;;  %v61_v54 = vpack.c.bf16 %v55_v49, %v55_v49  ;;  %v60_v5 = vpack.c.bf16 %v54_v3, %v54_v3 }
  0x4a   :  { %478 = vmatprep.mubr.bf16.mxu0 %v57_v50 }
  0x4b   :  { %479 = vmatmul.mubr.bf16.vlgmr.msra.gmra.mrb[0].mxu0 %v56_v51 }
  0x4c   :  { %677 = vmatpush3.bf16.msra.mxu0 %v736_v52  ;;  %558 = vmatprep.mubr.bf16.mxu0 %v61_v54 }
  0x4d   :  { %678 = vmatprep.subr.bf16.mxu0 %v737_v53 }
  0x50   :  { %679 = vmatpush3.bf16.msra.mxu0 %v738_v55 }
  0x51   :  { %680 = vmatprep.subr.bf16.mxu0 %v739_v56 }
  0x54   :  { %681 = vmatpush3.bf16.msra.mxu0 %v740_v57 }
  0x55   :  { %682 = vmatprep.subr.bf16.mxu0 %v741_v58 }
  0x58   :  { %683 = vmatpush3.bf16.msra.mxu0 %v742_v59 }
  0x59   :  { %684 = vmatprep.subr.bf16.mxu0 %v743_v60 }
  0x5c   :  { %685 = vmatpush3.bf16.msra.mxu0 %v744_v61 }
  0x5d   :  { %686 = vmatprep.subr.bf16.mxu0 %v745_v62 }
  0x60   :  { %687 = vmatpush3.bf16.msra.mxu0 %v746_v63 }
  0x61   :  { %688 = vmatprep.subr.bf16.mxu0 %v747_v0 }
  0x64   :  { %689 = vmatpush3.bf16.msra.mxu0 %v748_v1 }
  0x65   :  { %690 = vmatprep.subr.bf16.mxu0 %v749_v2 }
  0x68   :  { %691 = vmatpush3.bf16.msra.mxu0 %v750_v4 }
  0x6b   :  { %559 = vmatmul.mubr.bf16.vlgmr.msra.gmra.mrb[4].mxu0 %v60_v5 }
 0x11c   :  { %v670_v6 = vpop.f32.mrb[0].mxu1 }
 0x11d   :  { %v671_v7 = vpop.f32.mrb[1].mxu1 }
 0x11e   :  { %v648_v8 = vpop.f32.mrb[0].mxu0  ;;  %v672_v9 = vadd.f32 %v671_v7, %v670_v6  ;;  %v673_v10 = vpop.f32.mrb[2].mxu1 }
 0x11f   :  { %v649_v11 = vpop.f32.mrb[1].mxu0  ;;  %v674_v12 = vpop.f32.mrb[3].mxu1 }
 0x120   :  { %v650_v13 = vadd.f32 %v649_v11, %v648_v8  ;;  %v651_v14 = vpop.f32.mrb[2].mxu0 }
 0x121   :  { %v652_v15 = vpop.f32.mrb[3].mxu0 }
 0x122   :  { %v521_v16 = vadd.f32 %v672_v9, %v650_v13 }
 0x13e   :  { %v692_v17 = vpop.f32.mrb[4].mxu0 }
 0x13f   :  { %v693_v18 = vpop.f32.mrb[5].mxu0 }
 0x140   :  { %v694_v19 = vadd.f32 %v693_v18, %v692_v17  ;;  %v695_v20 = vpop.f32.mrb[6].mxu0 }
 0x141   :  { %v696_v21 = vpop.f32.mrb[7].mxu0 }
 0x142   :  { %v561_v22 = vadd.f32 %v694_v19, %v521_v16 }
 0x144   :  { %566 = vst [vmem:[#allocation7] sm:$0xff] %v561_v22 }
 0x145   :  { %808 = shalt.err (!%p805_p6)
}
 0x146   :  { %s809_s10 = scalar_lea.hbm %s890_s2, 128 }
 0x147   :  { %p810_p7 = scmp.ne.s32.totalorder %s890_s2, %s809_s10  ;;  %p813_p8 = scmp.lt.u32.totalorder %s809_s10, %s890_s2 }
 0x149   :  { %p815_p9 = pnand %p813_p8, %p810_p7 }
 0x14b   :  { %818 = shalt.err (!%p815_p9)
}
 0x14c   :  { %576 = dma.vmem_to_hbm [thread:$0]  %s574_s6, 128, %s890_s2, [#allocation4]  }
 0x14d   :  { %823 = dma.done.wait [#allocation4], 128  }
 0x14e   :  { %824 = vsyncadd [#allocation4], 4294967168 }
 0x14f   :  { %580 = vsyncpa [#allocation3], 1 }
 0x150   :  { %581 = vsyncpa [#allocation6], 1 }
 0x151   :  { %582 = vsyncpa [#allocation4], 1 }

</bundles_post_ra>
